<compile_context>
chip_gen: v7x
topology: tpu7x:2x2x1
jax: 0.10.0
libtpu: 0.0.40
codegen_flags: <defaults>
</compile_context>

<pallas_src>
import jax
import jax.numpy as jnp
from jax.experimental import pallas as pl
from jax.experimental.pallas import tpu as pltpu


# ----------------------------- Pallas kernel ------------------------------ #

def _matmul_bias_kernel(x_ref, w_ref, b_ref, o_ref):
    # x_ref: (tm, K) f32   w_ref: (K, tn) bf16   b_ref: (1, tn) f32   o_ref: (tm, tn)
    x = x_ref[...].astype(w_ref.dtype)          # in-kernel cast (VPU, hidden by MXU)
    acc = jnp.dot(x, w_ref[...], preferred_element_type=jnp.float32)
    o_ref[...] = (acc + b_ref[...]).astype(o_ref.dtype)


def _round_up(x, m):
    return ((x + m - 1) // m) * m


def fused_deconv_matmul(x, w, b, *, out_dtype=jnp.float32,
                        tm_max=512, tn_max=4096, vmem_budget=44 << 20):
    """y = x @ w + b in a single Pallas kernel, tiled over (columns, rows).

    x: [M, K] f32 (cast to w.dtype inside the kernel), w: [K, Ncols] (bf16),
    b: [1, Ncols] f32.  Ncols must be a multiple of 128 (lane-dense stores).
    """
    M, K = x.shape
    Kw, Ncols = w.shape
    assert K == Kw
    assert b.shape == (1, Ncols)
    assert Ncols % 128 == 0, "output columns must be lane-dense (multiple of 128)"

    # Column tile: largest multiple-of-128 divisor of Ncols that is <= tn_max.
    if Ncols <= tn_max:
        tn = Ncols
    else:
        tn = next(t for t in range(tn_max, 127, -128) if Ncols % t == 0)

    # Row tile: large enough to amortize per-step overhead, small enough that the
    # row grid has >=2 (tiny M) / >=4 steps for megacore split + DMA/compute overlap.
    min_steps = 4 if M >= 64 else 2
    tm = max(8, min(tm_max, pl.cdiv(M, min_steps)))
    tm = _round_up(tm, 16) if tm >= 16 else _round_up(tm, 8)

    in_b = x.dtype.itemsize
    w_b = w.dtype.itemsize
    out_b = jnp.dtype(out_dtype).itemsize

    def vmem_need(tm_):
        # double-buffered input / weight / bias / output blocks (bias sublane-padded)
        return 2 * (tm_ * K * in_b + K * tn * w_b + 8 * tn * 4 + tm_ * tn * out_b)

    while vmem_need(tm) > vmem_budget and tm > 16:
        tm = max(16, _round_up(tm // 2, 16))

    need = vmem_need(tm)
    # Size the scoped VMEM to actual need (+margin); never claim all of v7x's 64 MiB.
    vmem_limit = max(min(int(need * 1.25) + (2 << 20), 48 << 20),
                     need + (2 << 20), 32 << 20)

    # Rows innermost: the column-indexed weight block changes only once per column
    # sweep, so the full weight is streamed from HBM exactly once.
    grid = (Ncols // tn, pl.cdiv(M, tm))

    return pl.pallas_call(
        _matmul_bias_kernel,
        out_shape=jax.ShapeDtypeStruct((M, Ncols), out_dtype),
        grid=grid,
        in_specs=[
            pl.BlockSpec((tm, K), lambda j, i: (i, 0)),
            pl.BlockSpec((K, tn), lambda j, i: (0, j)),
            pl.BlockSpec((1, tn), lambda j, i: (0, j)),
        ],
        out_specs=pl.BlockSpec((tm, tn), lambda j, i: (i, j)),
        compiler_params=pltpu.CompilerParams(
            dimension_semantics=("parallel", "parallel"),
            vmem_limit_bytes=int(vmem_limit),
        ),
    )(x, w, b)


# ------------------ fuse two stride==kernel ConvTranspose3d ---------------- #

def compose_deconv_pair(w1, b1, w2, b2, k):
    """Pre-compose two ConvTranspose3d (kernel==stride==k) into one linear map.

    w1: [Cin, Cmid, k,k,k], b1: [Cmid], w2: [Cmid, Cout, k,k,k], b2: [Cout]
    Returns wm: [Cin, Cout*(k*k)**3] and bm: [Cout*(k*k)**3] with columns
    ordered (cout, A1, A2, A3), A = a*k + p (first-stage offset a, second p).
    """
    Cin = w1.shape[0]
    Cout = w2.shape[1]
    up = k * k
    wc = jnp.einsum('cmxyz,mopqr->coxpyqzr', w1, w2)
    wm = wc.reshape(Cin, Cout * up * up * up)
    bc = jnp.einsum('m,mopqr->opqr', b1, w2) + b2[:, None, None, None]
    bc = jnp.broadcast_to(bc[:, None, :, None, :, None, :],
                          (Cout, k, k, k, k, k, k)).reshape(Cout * up * up * up)
    return wm, bc


# ------------------------------ ViTAutoEnc --------------------------------- #

class ViTAutoEncPallas:
    """Forward-pass-equivalent of the PyTorch ViTAutoEnc.

    forward() of the PyTorch module only runs conv3d_transpose followed by
    conv3d_transpose_1; the patch embedding / transformer blocks / LayerNorm
    defined in __init__ are unused in forward and therefore not implemented.
    """

    def __init__(self, key, *, in_channels, hidden_size=32, deconv_chns=16,
                 out_channels=1, spatial_dims=3,
                 compute_dtype=jnp.bfloat16, out_dtype=jnp.float32):
        del in_channels  # only used by the (unused-in-forward) patch embedding
        assert spatial_dims == 3
        self.k = 4                       # new_patch_size = [4] * spatial_dims
        self.out_channels = out_channels
        self.out_dtype = out_dtype
        k = self.k
        k1, k2, k3, k4 = jax.random.split(key, 4)
        # PyTorch ConvTranspose3d default init (uniform, bound = 1/sqrt(fan)).
        fan1 = hidden_size * k ** 3
        bound1 = 1.0 / (fan1 ** 0.5)
        self.w1 = jax.random.uniform(k1, (hidden_size, deconv_chns, k, k, k),
                                     jnp.float32, -bound1, bound1)
        self.b1 = jax.random.uniform(k2, (deconv_chns,), jnp.float32,
                                     -bound1, bound1)
        fan2 = deconv_chns * k ** 3
        bound2 = 1.0 / (fan2 ** 0.5)
        self.w2 = jax.random.uniform(k3, (deconv_chns, out_channels, k, k, k),
                                     jnp.float32, -bound2, bound2)
        self.b2 = jax.random.uniform(k4, (out_channels,), jnp.float32,
                                     -bound2, bound2)

        # Fused per-voxel linear map, composed once in f32 at init time.
        self.wm, self.bm = compose_deconv_pair(self.w1, self.b1,
                                               self.w2, self.b2, k)
        # Kernel-ready operands cached at init (no per-call cast/reshape ops).
        self.wm_c = self.wm.astype(compute_dtype)
        self.bm_row = self.bm.reshape(1, -1).astype(jnp.float32)
        self.up = k * k   # total upsampling per spatial dim (16)

    def __call__(self, x):
        # x: [N, hidden_size, D, H, W]  (NCDHW, matching PyTorch)
        N, Cin, D, H, W = x.shape
        up, Cout = self.up, self.out_channels
        xm = jnp.transpose(x, (0, 2, 3, 4, 1)).reshape(N * D * H * W, Cin)
        y = fused_deconv_matmul(xm, self.wm_c, self.bm_row,
                                out_dtype=self.out_dtype)   # [M, Cout*up^3]
        y = y.reshape(N, D, H, W, Cout, up, up, up)
        # TODO(synk): this interleave is the one remaining XLA transpose; folding
        # it into the kernel needs an in-kernel lane->sublane relayout of the
        # result block (or a channels-last NDHWC module output to drop it).
        y = jnp.transpose(y, (0, 4, 1, 5, 2, 6, 3, 7))      # [N,Cout,D,up,H,up,W,up]
        return y.reshape(N, Cout, D * up, H * up, W * up)


# -------------------------- pure-JAX reference ----------------------------- #

def _ref_conv_transpose3d(x, w, b, k):
    """Unfused reference: ConvTranspose3d with kernel==stride==k, padding=0."""
    N, Cin, D, H, W = x.shape
    Cout = w.shape[1]
    y = jnp.einsum('ncijl,coabd->noiajbld', x, w)            # [N,Cout,D,k,H,k,W,k]
    y = y.reshape(N, Cout, D * k, H * k, W * k)
    return y + b[None, :, None, None, None]


# --------------------------------- main ------------------------------------ #

if __name__ == "__main__":
    key = jax.random.PRNGKey(0)
    kparam, kx = jax.random.split(key)

    batch = 2
    hidden_size = 32      # small stand-in for 768
    deconv_chns = 16
    out_channels = 1
    sp = 2                # input spatial size (D=H=W=2)

    model = ViTAutoEncPallas(kparam, in_channels=1, hidden_size=hidden_size,
                             deconv_chns=deconv_chns, out_channels=out_channels,
                             spatial_dims=3)

    x = jax.random.normal(kx, (batch, hidden_size, sp, sp, sp), jnp.float32)

    fwd = jax.jit(model.__call__)
    y = jax.block_until_ready(fwd(x))

    expected = (batch, out_channels, sp * 16, sp * 16, sp * 16)
    assert y.shape == expected, (y.shape, expected)
    assert y.dtype == jnp.float32

    # Verify the fused single-matmul kernel against the unfused f32 reference.
    y_ref = _ref_conv_transpose3d(x, model.w1, model.b1, model.k)
    y_ref = _ref_conv_transpose3d(y_ref, model.w2, model.b2, model.k)
    scale = float(jnp.max(jnp.abs(y_ref)))
    err = float(jnp.max(jnp.abs(y - y_ref)))
    assert err <= 1e-2 * max(1.0, scale), f"max abs error {err} (ref scale {scale})"

    print("KERNEL_OK")
</pallas_src>

<mosaic_0001>
module attributes {stable_mosaic.version = 11 : i64} {
  func.func @_matmul_bias_kernel(%arg0: i32, %arg1: i32, %arg2: memref<8x32xf32, #tpu.memory_space<vmem>>, %arg3: memref<32x4096xbf16, #tpu.memory_space<vmem>>, %arg4: memref<1x4096xf32, #tpu.memory_space<vmem>>, %arg5: memref<8x4096xf32, #tpu.memory_space<vmem>>) attributes {dimension_semantics = [#tpu.dimension_semantics<parallel>, #tpu.dimension_semantics<parallel>], iteration_bounds = array<i64: 1, 2>, scalar_prefetch = 0 : i64, scratch_operands = 0 : i64, tpu.core_type = #tpu.core_type<tc>, window_params = [{transform_indices = @transform_0, window_bounds = array<i64: 8, 32>}, {transform_indices = @transform_1, window_bounds = array<i64: 32, 4096>}, {transform_indices = @transform_2, window_bounds = array<i64: 1, 4096>}, {transform_indices = @transform_3, window_bounds = array<i64: 8, 4096>}]} {
    %c0 = arith.constant 0 : index
    %c0_0 = arith.constant 0 : index
    %0 = vector.load %arg2[%c0, %c0_0] : memref<8x32xf32, #tpu.memory_space<vmem>>, vector<8x32xf32>
    %1 = arith.truncf %0 : vector<8x32xf32> to vector<8x32xbf16>
    %c0_1 = arith.constant 0 : index
    %c0_2 = arith.constant 0 : index
    %2 = vector.load %arg3[%c0_1, %c0_2] : memref<32x4096xbf16, #tpu.memory_space<vmem>>, vector<32x4096xbf16>
    %cst = arith.constant dense<0.000000e+00> : vector<8x4096xf32>
    %3 = tpu.matmul %1, %2, %cst {dimension_numbers = #tpu.dot_dimension_numbers<[1], [0], [0], [1], [0, 0, 1, 1], [], []>} : vector<8x32xbf16>, vector<32x4096xbf16>, vector<8x4096xf32> -> vector<8x4096xf32>
    %c0_3 = arith.constant 0 : index
    %c0_4 = arith.constant 0 : index
    %4 = vector.load %arg4[%c0_3, %c0_4] : memref<1x4096xf32, #tpu.memory_space<vmem>>, vector<1x4096xf32>
    %5 = vector.broadcast %4 : vector<1x4096xf32> to vector<8x4096xf32>
    %6 = arith.addf %3, %5 : vector<8x4096xf32>
    %c0_5 = arith.constant 0 : index
    %c0_6 = arith.constant 0 : index
    %7 = vector.load %arg5[%c0_5, %c0_6] : memref<8x4096xf32, #tpu.memory_space<vmem>>, vector<8x4096xf32>
    tpu.vector_store %arg5[%c0_5, %c0_6], %6 {strides = array<i32>} : memref<8x4096xf32, #tpu.memory_space<vmem>>, vector<8x4096xf32>,
    return
  }
  func.func @transform_0(%arg0: i32, %arg1: i32) -> (i32, i32) {
    %c0_i32 = arith.constant 0 : i32
    %c0_i32_0 = arith.constant 0 : i32
    return %arg1, %c0_i32 : i32, i32
  }
  func.func @transform_1(%arg0: i32, %arg1: i32) -> (i32, i32) {
    %c0_i32 = arith.constant 0 : i32
    %c0_i32_0 = arith.constant 0 : i32
    return %c0_i32, %arg0 : i32, i32
  }
  func.func @transform_2(%arg0: i32, %arg1: i32) -> (i32, i32) {
    %c0_i32 = arith.constant 0 : i32
    %c0_i32_0 = arith.constant 0 : i32
    return %c0_i32, %arg0 : i32, i32
  }
  func.func @transform_3(%arg0: i32, %arg1: i32) -> (i32, i32) {
    %c0_i32 = arith.constant 0 : i32
    return %arg1, %arg0 : i32, i32
  }
}

</mosaic_0001>

<bundles_post_ra>
// kernel: a_call__.1
= control target key start
LH: loop header
LB: loop body
LE: loop exit
PB: predicated region body
PF: predicated region fallthrough
CT: control target
= control target key end

     0   :  { %8 = vsyncpa [#allocation3], 0  ;;  %s2411_s0 = inlined_call_operand.hbm [shape: f32[16,32], index: 0, kind: input, shape index: {}]   ;;  %s2412_s1 = inlined_call_operand.vmem [shape: bf16[32,4096], index: 1, kind: input, shape index: {}]   ;;  %s2413_s2 = inlined_call_operand.hbm [shape: f32[1,4096], index: 2, kind: input, shape index: {}]   ;;  %s2414_s3 = inlined_call_operand.vmem [shape: f32[16,4096], index: 3, kind: output, shape index: {}]  }
   0x1   :  { %10 = vsyncpa [#allocation3 + $0x1], 0 }
   0x2   :  { %11 = vsyncpa [#allocation5], 0  ;;  %s1921_s12 = smov 0   ;;  %s1923_s13 = smov 0  }
   0x3   :  { %s1925_s14 = smov 0   ;;  %s1927_s15 = smov 0  }
   0x4   :  { %s1929_s16 = smov 0   ;;  %s1931_s17 = smov 0  }
   0x5 LB: > { %s1621_s18 = sadd.s32 4294967295, %s1896_s17   ;;  %p49_p0 = scmp.ne.s32.totalorder %s1880_s13, %s1876_s12  ;;  %s1896_s17 = sphi %s1931_s17, %s17_s17   ;;  %s1892_s16 = sphi %s1929_s16, %s2433_s16   ;;  %s1888_s15 = sphi %s1927_s15, %s2432_s15   ;;  %s1884_s14 = sphi %s1925_s14, %s2431_s14   ;;  %s1880_s13 = sphi %s1923_s13, %s2430_s13   ;;  %s1876_s12 = sphi %s1921_s12, %s2429_s12  }
   0x6   : > { %p1951_p1 = scmp.eq.s32.totalorder %s1621_s18, 0  ;;  %p1623_p2 = scmp.ge.s32.totalorder %s1896_s17, 1 }
   0x7   : > { %p140_p3 = scmp.lt.s32.totalorder %s1896_s17, 3  ;;  %s1898_s22 = smov [#allocation4]  }
   0x8   : > { %s2419_s19 = scalar_select %p1951_p1, 1, 0 }
   0x9   : > { %p1959_p4 = por %p1951_p1, %p49_p0  ;;  %p1963_p5 = pnand %p1623_p2, %p140_p3 }
   0xa   : > { %s165_s23 = sshll.u32 %s1898_s22, 4  ;;  %s26_s25 = sadd.s32 1, %s1892_s16  ;;  %s166_s23 = int_to_ptr.vmem [resolvable:$true] %s165_s23 }
   0xb   : > { %s2420_s20 = scalar_select %p1959_p4, 1, 0 }
   0xc   : > { %s2421_s21 = scalar_select %p1963_p5, 1, 0 }
   0xd   : > { %p1723_p6 = pneg %p1963_p5  ;;  %s36_s26 = sadd.s32 1, %s1884_s14 }
   0xe   : > { %p1977_p8 = scmp.ge.s32.totalorder %s26_s25, 2  ;;  %s1784_s30 = scalar_lea.hbm %s2413_s2, 512 }
   0xf   : > { %p1971_p7 = pnand %p1723_p6, %p1951_p1  ;;  %p1785_p9 = scmp.ne.s32.totalorder %s2413_s2, %s1784_s30 }
  0x10   : > { %s2423_s27 = scalar_select %p1977_p8, 1, 0 }
  0x11   : > { %p1786_p10 = pneg %p1971_p7  ;;  %p1791_p13 = scmp.lt.u32.totalorder %s1784_s30, %s2413_s2 }
  0x13   : > { %p1787_p11 = pnand %p1786_p10, %p1785_p9 }
  0x15   : > { %p1788_p12 = pneg %p1787_p11 }
  0x17   : > { %p1793_p0 = pnand %p1791_p13, %p1788_p12 }
  0x19   : > { %1796 = shalt.err (!%p1793_p0)
}
  0x1a   : > { %s1797_s8 = scalar_lea.vmem %s166_s23, 512  ;;  %p1805_p1 = scmp.lt.s32.totalorder %s166_s23, %s166_s23 }
  0x1b   : > { %p1798_p2 = scmp.ne.s32.totalorder %s166_s23, %s1797_s8  ;;  %p1806_p4 = scmp.lt.s32.totalorder %s1797_s8, %s1797_s8 }
  0x1d   : > { %p1800_p3 = pnand %p1798_p2, %p1786_p10  ;;  %p1807_p5 = por %p1806_p4, %p1805_p1 }
  0x1f   : > { %p1801_p6 = pneg %p1800_p3 }
  0x21   : > { %p1808_p8 = pnand %p1807_p5, %p1801_p6 }
  0x23   : > { %1811 = shalt.err (!%p1808_p8)
}
  0x24   : > { %1726 = dma.hbm_to_vmem [thread:$0]  (!%p1971_p7), %s2413_s2, 512, %s166_s23, [#allocation5]  }
  0x25   : > { %p2424_p9 = scmp.ne.s32.totalorder %s2423_s27, 0  ;;  %p43_p1 = scmp.ne.s32.totalorder %s1884_s14, %s1880_s13 }
  0x26   : > { %p44_p4 = scmp.eq.s32.totalorder %s1896_s17, 0  ;;  %p1732_p5 = scmp.lt.s32.totalorder %s1896_s17, 2 }
  0x27   : > { %s2435_s25 = smov (%p2424_p9, %s26_s25), 0  ;;  %s176_s12 = sand.u32 1, %s1884_s14  }
  0x28   : > { %s33_s11 = ssub.s32 %s1892_s16, %s2435_s25  ;;  %p45_p10 = por %p44_p4, %p43_p1 }
  0x29   : > { %p34_p8 = scmp.eq.s32.totalorder %s33_s11, 0  ;;  %s1628_s18 = sshll.u32 %s1892_s16, 7 }
  0x2a   : > { %s1627_s24 = sshll.u32 %s176_s12, 3  ;;  %s2017_s23 = scalar_lea.hbm %s2411_s0, %s1628_s18 }
  0x2b   : > { %s2012_s22 = scalar_select %p34_p8, %s1884_s14, %s36_s26  }
  0x2c   : > { %s180_s27 = scalar_lea.vmem [#allocation2], %s1627_s24  ;;  %p2019_p7 = pnand %p1732_p5, %p45_p10 }
  0x2d   : > { %s187_s30 = sshll.u32 %s180_s27, 4  ;;  %s177_s26 = scalar_lea.sflag [#allocation3], %s176_s12  ;;  %s2023_s30 = int_to_ptr.vmem [resolvable:$true] %s187_s30 }
  0x2e   : > { %s1812_s5 = scalar_lea.hbm %s2017_s23, 128  ;;  %p1814_p12 = pneg %p2019_p7 }
  0x2f   : > { %p1813_p11 = scmp.ne.s32.totalorder %s2017_s23, %s1812_s5  ;;  %s1817_s8 = scalar_lea.hbm %s2411_s0, 256 }
  0x30   : > { %p1818_p2 = scmp.lt.u32.totalorder %s2017_s23, %s2411_s0  ;;  %p1819_p3 = scmp.lt.u32.totalorder %s1817_s8, %s1812_s5 }
  0x31   : > { %p1815_p13 = pnand %p1814_p12, %p1813_p11  ;;  %p1821_p9 = scmp.lt.u32.totalorder %s1812_s5, %s2017_s23 }
  0x32   : > { %p1820_p6 = por %p1819_p3, %p1818_p2 }
  0x33   : > { %p1816_p0 = pneg %p1815_p13 }
  0x34   : > { %p1822_p1 = por %p1821_p9, %p1820_p6 }
  0x36   : > { %p1823_p4 = pnand %p1822_p1, %p1816_p0 }
  0x38   : > { %1826 = shalt.err (!%p1823_p4)
}
  0x39   : > { %s1827_s11 = scalar_lea.vmem %s2023_s30, 128  ;;  %s1899_s12 = smov [#allocation2]  }
  0x3a   : > { %p1828_p5 = scmp.ne.s32.totalorder %s2023_s30, %s1827_s11  ;;  %s1832_s18 = sshll.u32 %s1899_s12, 4  ;;  %s1833_s18 = int_to_ptr.vmem [resolvable:$false] %s1832_s18 }
  0x3b   : > { %s1834_s24 = scalar_lea.vmem %s1833_s18, 256  ;;  %p1835_p11 = scmp.lt.s32.totalorder %s2023_s30, %s1833_s18 }
  0x3c   : > { %p1830_p8 = pnand %p1828_p5, %p1814_p12  ;;  %p1836_p13 = scmp.lt.s32.totalorder %s1834_s24, %s1827_s11 }
  0x3e   : > { %p1831_p10 = pneg %p1830_p8  ;;  %p1837_p2 = por %p1836_p13, %p1835_p11 }
  0x40   : > { %p1838_p3 = pnand %p1837_p2, %p1831_p10 }
  0x42   : > { %1841 = shalt.err (!%p1838_p3)
}
  0x43   : > { %1730 = dma.hbm_to_vmem [thread:$0]  (!%p2019_p7), %s2017_s23, 128, %s2023_s30, %s177_s26  }
  0x44   : > { %p2426_p0 = scmp.ne.s32.totalorder %s2421_s21, 0 }
  0x45   : > { %s198_s28 = sand.u32 (!%p2426_p0), 1, %s1880_s13   ;;  %p2427_p12 = scmp.ne.s32.totalorder (!%p2426_p0), %s2420_s20, 0 }
  0x46   : > { %196 = sbr.rel (%p2426_p0) target bundleno = 365 (0x16d), region = 32  ;;  %s2053_s29 = sshll.u32 (!%p2426_p0), %s198_s28, 3 }
  0x47   : > { %s199_s27 = scalar_lea.sflag (!%p2426_p0), [#allocation3], %s198_s28  ;;  %s202_s5 = scalar_lea.vmem (!%p2426_p0), [#allocation2], %s2053_s29 }
  0x4d   : > { %1867 = dma.done.wait (%p2427_p12), %s199_s27, 128  }
  0x4e   : > { %1869 = vsyncadd (%p2427_p12), %s199_s27, 4294967168  ;;  %p2428_p6 = scmp.ne.s32.totalorder %s2419_s19, 0 }
  0x50   : > { %1871 = dma.done.wait (%p2428_p6), [#allocation5], 512  }
  0x51   : > { %1873 = vsyncadd (%p2428_p6), [#allocation5], 4294966784  ;;  %v1900_v0 = vmov 0   ;;  %v258_v1 = vld [vmem:[%s2412_s1] sm:$0xff]  ;;  %v259_v3 = vld [vmem:[%s2412_s1 + $0x8] sm:$0xff]  ;;  %vm810_vm0 = vcmask 261120  }
  0x52   : > { %846 = vmatprep.mubr.bf16.mxu0 %v1900_v0  ;;  %887 = vmatprep.mubr.bf16.mxu1 %v1900_v0  ;;  %v274_v2 = vld [vmem:[%s2412_s1 + $0x80] sm:$0xff]  ;;  %v275_v5 = vld [vmem:[%s2412_s1 + $0x88] sm:$0xff]  ;;  %v260_v15 = vld [vmem:[%s2412_s1 + $0x10] sm:$0xff]  ;;  %p246_p7 = scmp.lt.s32.totalorder %s1888_s15, 1 }
  0x53   : > { %v1635_v4 = vcombine.high %v258_v1, %v274_v2  ;;  %v1634_v6 = vcombine.low %v258_v1, %v274_v2  ;;  %v290_v7 = vld [vmem:[%s2412_s1 + $0x100] sm:$0xff]  ;;  %v1637_v9 = vcombine.high %v259_v3, %v275_v5  ;;  %v1636_v10 = vcombine.low %v259_v3, %v275_v5  ;;  %v291_v12 = vld [vmem:[%s2412_s1 + $0x108] sm:$0xff]  ;;  %v276_v16 = vld [vmem:[%s2412_s1 + $0x90] sm:$0xff] }
  0x54   : > { %v306_v8 = vld [vmem:[%s2412_s1 + $0x180] sm:$0xff]  ;;  %v307_v13 = vld [vmem:[%s2412_s1 + $0x188] sm:$0xff]  ;;  %v261_v17 = vld [vmem:[%s2412_s1 + $0x18] sm:$0xff]  ;;  %v1639_v22 = vcombine.high %v260_v15, %v276_v16  ;;  %v1638_v29 = vcombine.low %v260_v15, %v276_v16  ;;  %s2437_s15 = smov (!%p246_p7, %s1888_s15), 1 }
  0x55   : > { %v1667_v11 = vcombine.high %v290_v7, %v306_v8  ;;  %814 = vmatprep.subr.bf16.mxu0 %v1635_v4  ;;  %v1669_v14 = vcombine.high %v291_v12, %v307_v13  ;;  %855 = vmatprep.subr.bf16.mxu1 %v1637_v9  ;;  %v1666_v18 = vcombine.low %v290_v7, %v306_v8  ;;  %v256_v19 = vld [vmem:[%s202_s5] sm:$0xff]  ;;  %v277_v20 = vld [vmem:[%s2412_s1 + $0x98] sm:$0xff]  ;;  %v292_v24 = vld [vmem:[%s2412_s1 + $0x110] sm:$0xff]  ;;  %s1716_s5 = sshll.u32 %s2437_s15, 8 }
  0x56   : > { %815 = vmatpush1.bf16.msra.mxu0 %v1634_v6  ;;  %856 = vmatpush1.bf16.msra.mxu1 %v1636_v10  ;;  %v1668_v21 = vcombine.low %v291_v12, %v307_v13  ;;  %v1641_v23 = vcombine.high %v261_v17, %v277_v20  ;;  %v308_v25 = vld [vmem:[%s2412_s1 + $0x190] sm:$0xff]  ;;  %v2108_v26 = vpack.c.bf16 %v256_v19, %v256_v19  ;;  %v293_v27 = vld [vmem:[%s2412_s1 + $0x118] sm:$0xff]  ;;  %v262_v33 = vld [vmem:[%s2412_s1 + $0x20] sm:$0xff]  ;;  %s2323_s10 = scalar_lea.vmem %s2414_s3, %s1716_s5 }
  0x57   : > { %816 = vmatprep.subr.bf16.mxu0 %v1667_v11  ;;  %857 = vmatprep.subr.bf16.mxu1 %v1669_v14  ;;  %v309_v28 = vld [vmem:[%s2412_s1 + $0x198] sm:$0xff]  ;;  %v1640_v30 = vcombine.low %v261_v17, %v277_v20  ;;  %v1671_v31 = vcombine.high %v292_v24, %v308_v25  ;;  %v278_v34 = vld [vmem:[%s2412_s1 + $0xa0] sm:$0xff]  ;;  %v263_v35 = vld [vmem:[%s2412_s1 + $0x28] sm:$0xff]  ;;  %v1670_v37 = vcombine.low %v292_v24, %v308_v25 }
  0x58   : > { %v1673_v32 = vcombine.high %v293_v27, %v309_v28  ;;  %v279_v36 = vld [vmem:[%s2412_s1 + $0xa8] sm:$0xff]  ;;  %v1672_v38 = vcombine.low %v293_v27, %v309_v28  ;;  %v1643_v39 = vcombine.high %v262_v33, %v278_v34  ;;  %v294_v41 = vld [vmem:[%s2412_s1 + $0x120] sm:$0xff]  ;;  %v1642_v45 = vcombine.low %v262_v33, %v278_v34  ;;  %v264_v49 = vld [vmem:[%s2412_s1 + $0x30] sm:$0xff] }
  0x59   : > { %v1645_v40 = vcombine.high %v263_v35, %v279_v36  ;;  %v310_v42 = vld [vmem:[%s2412_s1 + $0x1a0] sm:$0xff]  ;;  %v295_v43 = vld [vmem:[%s2412_s1 + $0x128] sm:$0xff]  ;;  %v1644_v46 = vcombine.low %v263_v35, %v279_v36  ;;  %v280_v50 = vld [vmem:[%s2412_s1 + $0xb0] sm:$0xff] }
  0x5a   : > { %817 = vmatpush1.bf16.msra.mxu0 %v1666_v18  ;;  %858 = vmatpush1.bf16.msra.mxu1 %v1668_v21  ;;  %v311_v44 = vld [vmem:[%s2412_s1 + $0x1a8] sm:$0xff]  ;;  %v1675_v47 = vcombine.high %v294_v41, %v310_v42  ;;  %v265_v51 = vld [vmem:[%s2412_s1 + $0x38] sm:$0xff]  ;;  %v1674_v53 = vcombine.low %v294_v41, %v310_v42  ;;  %v1647_v55 = vcombine.high %v264_v49, %v280_v50  ;;  %v296_v57 = vld [vmem:[%s2412_s1 + $0x130] sm:$0xff] }
  0x5b   : > { %896 = vmatprep.subr.bf16.mxu0 %v1639_v22  ;;  %937 = vmatprep.subr.bf16.mxu1 %v1641_v23  ;;  %v1677_v48 = vcombine.high %v295_v43, %v311_v44  ;;  %v281_v52 = vld [vmem:[%s2412_s1 + $0xb8] sm:$0xff]  ;;  %v1676_v54 = vcombine.low %v295_v43, %v311_v44  ;;  %v312_v58 = vld [vmem:[%s2412_s1 + $0x1b0] sm:$0xff]  ;;  %v1646_v61 = vcombine.low %v264_v49, %v280_v50  ;;  %v266_v2 = vld [vmem:[%s2412_s1 + $0x40] sm:$0xff] }
  0x5c   : > { %v1649_v56 = vcombine.high %v265_v51, %v281_v52  ;;  %v297_v59 = vld [vmem:[%s2412_s1 + $0x138] sm:$0xff]  ;;  %v1648_v62 = vcombine.low %v265_v51, %v281_v52  ;;  %v1679_v63 = vcombine.high %v296_v57, %v312_v58  ;;  %v282_v3 = vld [vmem:[%s2412_s1 + $0xc0] sm:$0xff]  ;;  %v267_v4 = vld [vmem:[%s2412_s1 + $0x48] sm:$0xff]  ;;  %v1678_v6 = vcombine.low %v296_v57, %v312_v58 }
  0x5d   : > { %1698 = vmatmul.mubr.msk.bf16.vlgmr.msra.gmra.mrb[0].mxu0 %vm810_vm0, %v2108_v26  ;;  %1699 = vmatmul.mubr.msk.bf16.vlgmr.msra.gmra.mrb[0].mxu1 %vm810_vm0, %v2108_v26  ;;  %v313_v60 = vld [vmem:[%s2412_s1 + $0x1b8] sm:$0xff]  ;;  %v283_v5 = vld [vmem:[%s2412_s1 + $0xc8] sm:$0xff]  ;;  %v1651_v8 = vcombine.high %v266_v2, %v282_v3  ;;  %v298_v10 = vld [vmem:[%s2412_s1 + $0x140] sm:$0xff]  ;;  %v1650_v14 = vcombine.low %v266_v2, %v282_v3 }
  0x5e   : > { %897 = vmatpush1.bf16.msra.mxu0 %v1638_v29  ;;  %938 = vmatpush1.bf16.msra.mxu1 %v1640_v30  ;;  %v1681_v1 = vcombine.high %v297_v59, %v313_v60  ;;  %v1680_v7 = vcombine.low %v297_v59, %v313_v60  ;;  %v1653_v9 = vcombine.high %v267_v4, %v283_v5  ;;  %v314_v11 = vld [vmem:[%s2412_s1 + $0x1c0] sm:$0xff]  ;;  %v299_v12 = vld [vmem:[%s2412_s1 + $0x148] sm:$0xff]  ;;  %v268_v18 = vld [vmem:[%s2412_s1 + $0x50] sm:$0xff] }
  0x5f   : > { %898 = vmatprep.subr.bf16.mxu0 %v1671_v31  ;;  %939 = vmatprep.subr.bf16.mxu1 %v1673_v32  ;;  %v315_v13 = vld [vmem:[%s2412_s1 + $0x1c8] sm:$0xff]  ;;  %v1652_v15 = vcombine.low %v267_v4, %v283_v5  ;;  %v1683_v16 = vcombine.high %v298_v10, %v314_v11  ;;  %v284_v19 = vld [vmem:[%s2412_s1 + $0xd0] sm:$0xff]  ;;  %v269_v20 = vld [vmem:[%s2412_s1 + $0x58] sm:$0xff]  ;;  %v1682_v22 = vcombine.low %v298_v10, %v314_v11 }
  0x60   : > { %928 = vmatprep.mubr.bf16.mxu0 %v1900_v0  ;;  %969 = vmatprep.mubr.bf16.mxu1 %v1900_v0  ;;  %v1685_v17 = vcombine.high %v299_v12, %v315_v13  ;;  %v285_v21 = vld [vmem:[%s2412_s1 + $0xd8] sm:$0xff]  ;;  %v1684_v23 = vcombine.low %v299_v12, %v315_v13  ;;  %v1655_v24 = vcombine.high %v268_v18, %v284_v19  ;;  %v300_v27 = vld [vmem:[%s2412_s1 + $0x150] sm:$0xff]  ;;  %v270_v35 = vld [vmem:[%s2412_s1 + $0x60] sm:$0xff] }
  0x61   : > { %v1657_v25 = vcombine.high %v269_v20, %v285_v21  ;;  %v316_v28 = vld [vmem:[%s2412_s1 + $0x1d0] sm:$0xff]  ;;  %v301_v29 = vld [vmem:[%s2412_s1 + $0x158] sm:$0xff]  ;;  %v1654_v31 = vcombine.low %v268_v18, %v284_v19  ;;  %v1656_v32 = vcombine.low %v269_v20, %v285_v21  ;;  %v286_v36 = vld [vmem:[%s2412_s1 + $0xe0] sm:$0xff] }
  0x62   : > { %899 = vmatpush1.bf16.msra.mxu0 %v1670_v37  ;;  %940 = vmatpush1.bf16.msra.mxu1 %v1672_v38  ;;  %v317_v30 = vld [vmem:[%s2412_s1 + $0x1d8] sm:$0xff]  ;;  %v1687_v33 = vcombine.high %v300_v27, %v316_v28  ;;  %v271_v37 = vld [vmem:[%s2412_s1 + $0x68] sm:$0xff]  ;;  %v1659_v41 = vcombine.high %v270_v35, %v286_v36  ;;  %v302_v43 = vld [vmem:[%s2412_s1 + $0x160] sm:$0xff] }
  0x63   : > { %978 = vmatprep.subr.bf16.mxu0 %v1643_v39  ;;  %1019 = vmatprep.subr.bf16.mxu1 %v1645_v40  ;;  %v1689_v34 = vcombine.high %v301_v29, %v317_v30  ;;  %v287_v38 = vld [vmem:[%s2412_s1 + $0xe8] sm:$0xff]  ;;  %v1686_v39 = vcombine.low %v300_v27, %v316_v28  ;;  %v1688_v40 = vcombine.low %v301_v29, %v317_v30  ;;  %v318_v44 = vld [vmem:[%s2412_s1 + $0x1e0] sm:$0xff]  ;;  %v272_v51 = vld [vmem:[%s2412_s1 + $0x70] sm:$0xff] }
  0x64   : > { %v1661_v42 = vcombine.high %v271_v37, %v287_v38  ;;  %v1691_v49 = vcombine.high %v302_v43, %v318_v44  ;;  %v288_v52 = vld [vmem:[%s2412_s1 + $0xf0] sm:$0xff] }
  0x65   : > { %1700 = vmatmul.mubr.msk.bf16.vlgmr.msra.gmra.mrb[4].mxu0 %vm810_vm0, %v2108_v26  ;;  %1701 = vmatmul.mubr.msk.bf16.vlgmr.msra.gmra.mrb[4].mxu1 %vm810_vm0, %v2108_v26  ;;  %v1663_v57 = vcombine.high %v272_v51, %v288_v52  ;;  %v304_v59 = vld [vmem:[%s2412_s1 + $0x170] sm:$0xff] }
  0x66   : > { %979 = vmatpush1.bf16.msra.mxu0 %v1642_v45  ;;  %1020 = vmatpush1.bf16.msra.mxu1 %v1644_v46  ;;  %v303_v45 = vld [vmem:[%s2412_s1 + $0x168] sm:$0xff]  ;;  %v320_v60 = vld [vmem:[%s2412_s1 + $0x1f0] sm:$0xff] }
  0x67   : > { %980 = vmatprep.subr.bf16.mxu0 %v1675_v47  ;;  %1021 = vmatprep.subr.bf16.mxu1 %v1677_v48  ;;  %v319_v46 = vld [vmem:[%s2412_s1 + $0x1e8] sm:$0xff]  ;;  %v1658_v47 = vcombine.low %v270_v35, %v286_v36  ;;  %v1660_v48 = vcombine.low %v271_v37, %v287_v38  ;;  %v1695_v2 = vcombine.high %v304_v59, %v320_v60 }
  0x68   : > { %1010 = vmatprep.mubr.bf16.mxu0 %v1900_v0  ;;  %1051 = vmatprep.mubr.bf16.mxu1 %v1900_v0  ;;  %v1693_v50 = vcombine.high %v303_v45, %v319_v46  ;;  %v1694_v4 = vcombine.low %v304_v59, %v320_v60 }
  0x6a   : > { %981 = vmatpush1.bf16.msra.mxu0 %v1674_v53  ;;  %1022 = vmatpush1.bf16.msra.mxu1 %v1676_v54  ;;  %v273_v53 = vld [vmem:[%s2412_s1 + $0x78] sm:$0xff] }
  0x6b   : > { %1060 = vmatprep.subr.bf16.mxu0 %v1647_v55  ;;  %1101 = vmatprep.subr.bf16.mxu1 %v1649_v56  ;;  %v289_v54 = vld [vmem:[%s2412_s1 + $0xf8] sm:$0xff]  ;;  %v1690_v55 = vcombine.low %v302_v43, %v318_v44  ;;  %v1692_v56 = vcombine.low %v303_v45, %v319_v46 }
  0x6c   : > { %v1665_v58 = vcombine.high %v273_v53, %v289_v54  ;;  %v323_v44 = vld [vmem:[#allocation4 + $0x8] sm:$0xff] }
  0x6d   : > { %1702 = vmatmul.mubr.msk.bf16.vlgmr.msra.gmra.mrb[8].mxu0 %vm810_vm0, %v2108_v26  ;;  %1703 = vmatmul.mubr.msk.bf16.vlgmr.msra.gmra.mrb[8].mxu1 %vm810_vm0, %v2108_v26 }
  0x6e   : > { %1061 = vmatpush1.bf16.msra.mxu0 %v1646_v61  ;;  %1102 = vmatpush1.bf16.msra.mxu1 %v1648_v62  ;;  %v305_v61 = vld [vmem:[%s2412_s1 + $0x178] sm:$0xff] }
  0x6f   : > { %1062 = vmatprep.subr.bf16.mxu0 %v1679_v63  ;;  %1103 = vmatprep.subr.bf16.mxu1 %v1681_v1  ;;  %v321_v62 = vld [vmem:[%s2412_s1 + $0x1f8] sm:$0xff]  ;;  %v1662_v63 = vcombine.low %v272_v51, %v288_v52  ;;  %v1664_v1 = vcombine.low %v273_v53, %v289_v54 }
  0x70   : > { %1092 = vmatprep.mubr.bf16.mxu0 %v1900_v0  ;;  %1133 = vmatprep.mubr.bf16.mxu1 %v1900_v0  ;;  %v1697_v3 = vcombine.high %v305_v61, %v321_v62  ;;  %v1696_v5 = vcombine.low %v305_v61, %v321_v62 }
  0x72   : > { %1063 = vmatpush1.bf16.msra.mxu0 %v1678_v6  ;;  %1104 = vmatpush1.bf16.msra.mxu1 %v1680_v7  ;;  %v330_v6 = vlaneseq }
  0x73   : > { %1142 = vmatprep.subr.bf16.mxu0 %v1651_v8  ;;  %1183 = vmatprep.subr.bf16.mxu1 %v1653_v9  ;;  %v322_v9 = vld [vmem:[#allocation4] sm:$0xff] }
  0x74   : > { %v331_v7 = vshrl.u32 %v330_v6, 7 }
  0x75   : > { %1704 = vmatmul.mubr.msk.bf16.vlgmr.msra.gmra.mrb[12].mxu0 %vm810_vm0, %v2108_v26  ;;  %1705 = vmatmul.mubr.msk.bf16.vlgmr.msra.gmra.mrb[12].mxu1 %vm810_vm0, %v2108_v26 }
  0x76   : > { %1143 = vmatpush1.bf16.msra.mxu0 %v1650_v14  ;;  %1184 = vmatpush1.bf16.msra.mxu1 %v1652_v15  ;;  %v2308_v8 = vsub.s32 0, %v331_v7  ;;  %v2310_v10 = vsub.s32 2, %v331_v7  ;;  %v2312_v11 = vsub.s32 1, %v331_v7  ;;  %v2325_v19 = vsub.s32 4, %v331_v7 }
  0x77   : > { %1144 = vmatprep.subr.bf16.mxu0 %v1683_v16  ;;  %1185 = vmatprep.subr.bf16.mxu1 %v1685_v17  ;;  %v2332_v30 = vsub.s32 7, %v331_v7 }
  0x78   : > { %1174 = vmatprep.mubr.bf16.mxu0 %v1900_v0  ;;  %1215 = vmatprep.mubr.bf16.mxu1 %v1900_v0  ;;  %v333_v12 = vrot.slane %v322_v9, %v2308_v8  ;;  %v341_v13 = vrot.slane %v322_v9, %v2310_v10  ;;  %v369_v51 = vrot.slane %v323_v44, %v2312_v11 }
  0x79   : > { %v361_v35 = vrot.slane %v322_v9, %v2332_v30 }
  0x7a   : > { %1145 = vmatpush1.bf16.msra.mxu0 %v1682_v22  ;;  %1186 = vmatpush1.bf16.msra.mxu1 %v1684_v23 }
  0x7b   : > { %1224 = vmatprep.subr.bf16.mxu0 %v1655_v24  ;;  %1265 = vmatprep.subr.bf16.mxu1 %v1657_v25  ;;  %v2327_v24 = vsub.s32 6, %v331_v7  ;;  %v2329_v25 = vsub.s32 5, %v331_v7 }
  0x7d   : > { %1706 = vmatmul.mubr.msk.bf16.vlgmr.msra.gmra.mrb[16].mxu0 %vm810_vm0, %v2108_v26  ;;  %1707 = vmatmul.mubr.msk.bf16.vlgmr.msra.gmra.mrb[16].mxu1 %vm810_vm0, %v2108_v26 }
  0x7e   : > { %1225 = vmatpush1.bf16.msra.mxu0 %v1654_v31  ;;  %1266 = vmatpush1.bf16.msra.mxu1 %v1656_v32  ;;  %v349_v32 = vrot.slane %v322_v9, %v2325_v19 }
  0x7f   : > { %1226 = vmatprep.subr.bf16.mxu0 %v1687_v33  ;;  %1267 = vmatprep.subr.bf16.mxu1 %v1689_v34  ;;  %v357_v33 = vrot.slane %v322_v9, %v2327_v24  ;;  %v353_v34 = vrot.slane %v322_v9, %v2329_v25 }
  0x80   : > { %1256 = vmatprep.mubr.bf16.mxu0 %v1900_v0  ;;  %1297 = vmatprep.mubr.bf16.mxu1 %v1900_v0 }
  0x82   : > { %1227 = vmatpush1.bf16.msra.mxu0 %v1686_v39  ;;  %1268 = vmatpush1.bf16.msra.mxu1 %v1688_v40 }
  0x83   : > { %1306 = vmatprep.subr.bf16.mxu0 %v1659_v41  ;;  %1347 = vmatprep.subr.bf16.mxu1 %v1661_v42 }
  0x85   : > { %1708 = vmatmul.mubr.msk.bf16.vlgmr.msra.gmra.mrb[20].mxu0 %vm810_vm0, %v2108_v26  ;;  %1709 = vmatmul.mubr.msk.bf16.vlgmr.msra.gmra.mrb[20].mxu1 %vm810_vm0, %v2108_v26 }
  0x86   : > { %1307 = vmatpush1.bf16.msra.mxu0 %v1658_v47  ;;  %1348 = vmatpush1.bf16.msra.mxu1 %v1660_v48 }
  0x87   : > { %1308 = vmatprep.subr.bf16.mxu0 %v1691_v49  ;;  %1349 = vmatprep.subr.bf16.mxu1 %v1693_v50  ;;  %v365_v49 = vrot.slane %v323_v44, %v2308_v8  ;;  %v373_v50 = vrot.slane %v323_v44, %v2310_v10 }
  0x88   : > { %1338 = vmatprep.mubr.bf16.mxu0 %v1900_v0  ;;  %1379 = vmatprep.mubr.bf16.mxu1 %v1900_v0 }
  0x8a   : > { %1309 = vmatpush1.bf16.msra.mxu0 %v1690_v55  ;;  %1350 = vmatpush1.bf16.msra.mxu1 %v1692_v56 }
  0x8b   : > { %1388 = vmatprep.subr.bf16.mxu0 %v1663_v57  ;;  %1429 = vmatprep.subr.bf16.mxu1 %v1665_v58 }
  0x8d   : > { %1710 = vmatmul.mubr.msk.bf16.vlgmr.msra.gmra.mrb[24].mxu0 %vm810_vm0, %v2108_v26  ;;  %1711 = vmatmul.mubr.msk.bf16.vlgmr.msra.gmra.mrb[24].mxu1 %vm810_vm0, %v2108_v26 }
  0x8e   : > { %1389 = vmatpush1.bf16.msra.mxu0 %v1662_v63  ;;  %1430 = vmatpush1.bf16.msra.mxu1 %v1664_v1 }
  0x8f   : > { %1390 = vmatprep.subr.bf16.mxu0 %v1695_v2  ;;  %1431 = vmatprep.subr.bf16.mxu1 %v1697_v3  ;;  %v381_v2 = vrot.slane %v323_v44, %v2325_v19  ;;  %v389_v3 = vrot.slane %v323_v44, %v2327_v24 }
  0x90   : > { %1420 = vmatprep.mubr.bf16.mxu0 %v1900_v0  ;;  %1461 = vmatprep.mubr.bf16.mxu1 %v1900_v0  ;;  %v2314_v0 = vsub.s32 3, %v331_v7 }
  0x92   : > { %1391 = vmatpush1.bf16.msra.mxu0 %v1694_v4  ;;  %1432 = vmatpush1.bf16.msra.mxu1 %v1696_v5  ;;  %v345_v14 = vrot.slane %v322_v9, %v2314_v0  ;;  %v377_v52 = vrot.slane %v323_v44, %v2314_v0  ;;  %v385_v4 = vrot.slane %v323_v44, %v2329_v25 }
  0x93   : > { %v393_v5 = vrot.slane %v323_v44, %v2332_v30 }
  0x95   : > { %1712 = vmatmul.mubr.msk.bf16.vlgmr.msra.gmra.mrb[28].mxu0 %vm810_vm0, %v2108_v26  ;;  %1713 = vmatmul.mubr.msk.bf16.vlgmr.msra.gmra.mrb[28].mxu1 %vm810_vm0, %v2108_v26  ;;  %v337_v26 = vrot.slane %v322_v9, %v2312_v11 }
 0x130   : > { %v848_v15 = vpop.f32.mrb[0].mxu0  ;;  %v889_v17 = vpop.f32.mrb[0].mxu1 }
 0x131   : > { %v849_v16 = vadd.f32 %v848_v15, %v333_v12  ;;  %v850_v18 = vpop.f32.mrb[1].mxu0  ;;  %v890_v20 = vadd.f32 %v889_v17, %v341_v13  ;;  %v891_v22 = vpop.f32.mrb[1].mxu1 }
 0x132   : > { %v851_v21 = vadd.f32 %v850_v18, %v337_v26  ;;  %v852_v23 = vpop.f32.mrb[2].mxu0  ;;  %v892_v27 = vadd.f32 %v891_v22, %v345_v14  ;;  %v893_v28 = vpop.f32.mrb[2].mxu1 }
 0x133   : > { %1470 = vst [vmem:[%s2323_s10] sm:$0xff] %v849_v16  ;;  %v853_v29 = vpop.f32.mrb[3].mxu0  ;;  %1472 = vst [vmem:[%s2323_s10 + $0x10] sm:$0xff] %v890_v20  ;;  %v894_v31 = vpop.f32.mrb[3].mxu1  ;;  %v324_v16 = vld [vmem:[#allocation4 + $0x10] sm:$0xff] }
 0x134   : > { %1471 = vst [vmem:[%s2323_s10 + $0x8] sm:$0xff] %v851_v21  ;;  %1473 = vst [vmem:[%s2323_s10 + $0x18] sm:$0xff] %v892_v27  ;;  %v397_v22 = vrot.slane %v324_v16, %v2308_v8  ;;  %v405_v23 = vrot.slane %v324_v16, %v2310_v10  ;;  %v401_v27 = vrot.slane %v324_v16, %v2312_v11 }
 0x135   : > { %v409_v28 = vrot.slane %v324_v16, %v2314_v0  ;;  %v417_v44 = vrot.slane %v324_v16, %v2329_v25 }
 0x138   : > { %v930_v36 = vpop.f32.mrb[4].mxu0  ;;  %v971_v38 = vpop.f32.mrb[4].mxu1 }
 0x139   : > { %v931_v37 = vadd.f32 %v930_v36, %v349_v32  ;;  %v932_v39 = vpop.f32.mrb[5].mxu0  ;;  %v972_v40 = vadd.f32 %v971_v38, %v357_v33  ;;  %v973_v42 = vpop.f32.mrb[5].mxu1 }
 0x13a   : > { %v933_v41 = vadd.f32 %v932_v39, %v353_v34  ;;  %v934_v43 = vpop.f32.mrb[6].mxu0  ;;  %v974_v45 = vadd.f32 %v973_v42, %v361_v35  ;;  %v975_v46 = vpop.f32.mrb[6].mxu1  ;;  %v413_v42 = vrot.slane %v324_v16, %v2325_v19 }
 0x13b   : > { %1474 = vst [vmem:[%s2323_s10 + $0x20] sm:$0xff] %v931_v37  ;;  %v935_v47 = vpop.f32.mrb[7].mxu0  ;;  %1476 = vst [vmem:[%s2323_s10 + $0x30] sm:$0xff] %v972_v40  ;;  %v976_v48 = vpop.f32.mrb[7].mxu1  ;;  %v421_v43 = vrot.slane %v324_v16, %v2327_v24 }
 0x13c   : > { %1475 = vst [vmem:[%s2323_s10 + $0x28] sm:$0xff] %v933_v41  ;;  %1477 = vst [vmem:[%s2323_s10 + $0x38] sm:$0xff] %v974_v45  ;;  %v425_v45 = vrot.slane %v324_v16, %v2332_v30 }
 0x140   : > { %v1012_v53 = vpop.f32.mrb[8].mxu0  ;;  %v1053_v55 = vpop.f32.mrb[8].mxu1 }
 0x141   : > { %v1013_v54 = vadd.f32 %v1012_v53, %v365_v49  ;;  %v1014_v56 = vpop.f32.mrb[9].mxu0  ;;  %v1054_v57 = vadd.f32 %v1053_v55, %v373_v50  ;;  %v1055_v59 = vpop.f32.mrb[9].mxu1 }
 0x142   : > { %v1015_v58 = vadd.f32 %v1014_v56, %v369_v51  ;;  %v1016_v60 = vpop.f32.mrb[10].mxu0  ;;  %v1056_v61 = vadd.f32 %v1055_v59, %v377_v52  ;;  %v1057_v62 = vpop.f32.mrb[10].mxu1 }
 0x143   : > { %1478 = vst [vmem:[%s2323_s10 + $0x40] sm:$0xff] %v1013_v54  ;;  %v1017_v63 = vpop.f32.mrb[11].mxu0  ;;  %1480 = vst [vmem:[%s2323_s10 + $0x50] sm:$0xff] %v1054_v57  ;;  %v1058_v1 = vpop.f32.mrb[11].mxu1  ;;  %v325_v54 = vld [vmem:[#allocation4 + $0x18] sm:$0xff] }
 0x144   : > { %1479 = vst [vmem:[%s2323_s10 + $0x48] sm:$0xff] %v1015_v58  ;;  %1481 = vst [vmem:[%s2323_s10 + $0x58] sm:$0xff] %v1056_v61  ;;  %v429_v59 = vrot.slane %v325_v54, %v2308_v8  ;;  %v437_v60 = vrot.slane %v325_v54, %v2310_v10  ;;  %v433_v61 = vrot.slane %v325_v54, %v2312_v11 }
 0x145   : > { %v441_v62 = vrot.slane %v325_v54, %v2314_v0  ;;  %v445_v11 = vrot.slane %v325_v54, %v2325_v19  ;;  %v453_v0 = vrot.slane %v325_v54, %v2327_v24 }
 0x148   : > { %v1094_v6 = vpop.f32.mrb[12].mxu0  ;;  %v1135_v9 = vpop.f32.mrb[12].mxu1 }
 0x149   : > { %v1095_v7 = vadd.f32 %v1094_v6, %v381_v2  ;;  %v1096_v12 = vpop.f32.mrb[13].mxu0  ;;  %v1136_v13 = vadd.f32 %v1135_v9, %v389_v3  ;;  %v1137_v14 = vpop.f32.mrb[13].mxu1 }
 0x14a   : > { %v1097_v26 = vadd.f32 %v1096_v12, %v385_v4  ;;  %v1098_v15 = vpop.f32.mrb[14].mxu0  ;;  %v1138_v17 = vadd.f32 %v1137_v14, %v393_v5  ;;  %v1139_v18 = vpop.f32.mrb[14].mxu1 }
 0x14b   : > { %1482 = vst [vmem:[%s2323_s10 + $0x60] sm:$0xff] %v1095_v7  ;;  %v1099_v20 = vpop.f32.mrb[15].mxu0  ;;  %1484 = vst [vmem:[%s2323_s10 + $0x70] sm:$0xff] %v1136_v13  ;;  %v1140_v21 = vpop.f32.mrb[15].mxu1  ;;  %v449_v13 = vrot.slane %v325_v54, %v2329_v25 }
 0x14c   : > { %1483 = vst [vmem:[%s2323_s10 + $0x68] sm:$0xff] %v1097_v26  ;;  %1485 = vst [vmem:[%s2323_s10 + $0x78] sm:$0xff] %v1138_v17  ;;  %v457_v26 = vrot.slane %v325_v54, %v2332_v30 }
 0x150   : > { %v1176_v29 = vpop.f32.mrb[16].mxu0  ;;  %v1217_v32 = vpop.f32.mrb[16].mxu1 }
 0x151   : > { %v1177_v31 = vadd.f32 %v1176_v29, %v397_v22  ;;  %v1178_v33 = vpop.f32.mrb[17].mxu0  ;;  %v1218_v34 = vadd.f32 %v1217_v32, %v405_v23  ;;  %v1219_v36 = vpop.f32.mrb[17].mxu1 }
 0x152   : > { %v1179_v35 = vadd.f32 %v1178_v33, %v401_v27  ;;  %v1180_v37 = vpop.f32.mrb[18].mxu0  ;;  %v1220_v38 = vadd.f32 %v1219_v36, %v409_v28  ;;  %v1221_v39 = vpop.f32.mrb[18].mxu1 }
 0x153   : > { %1486 = vst [vmem:[%s2323_s10 + $0x80] sm:$0xff] %v1177_v31  ;;  %v1181_v40 = vpop.f32.mrb[19].mxu0  ;;  %1488 = vst [vmem:[%s2323_s10 + $0x90] sm:$0xff] %v1218_v34  ;;  %v1222_v41 = vpop.f32.mrb[19].mxu1 }
 0x154   : > { %1487 = vst [vmem:[%s2323_s10 + $0x88] sm:$0xff] %v1179_v35  ;;  %1489 = vst [vmem:[%s2323_s10 + $0x98] sm:$0xff] %v1220_v38 }
 0x158   : > { %v1258_v46 = vpop.f32.mrb[20].mxu0  ;;  %v1299_v48 = vpop.f32.mrb[20].mxu1 }
 0x159   : > { %v1259_v47 = vadd.f32 %v1258_v46, %v413_v42  ;;  %v1260_v49 = vpop.f32.mrb[21].mxu0  ;;  %v1300_v50 = vadd.f32 %v1299_v48, %v421_v43  ;;  %v1301_v52 = vpop.f32.mrb[21].mxu1 }
 0x15a   : > { %v1261_v51 = vadd.f32 %v1260_v49, %v417_v44  ;;  %v1262_v53 = vpop.f32.mrb[22].mxu0  ;;  %v1302_v55 = vadd.f32 %v1301_v52, %v425_v45  ;;  %v1303_v56 = vpop.f32.mrb[22].mxu1 }
 0x15b   : > { %1490 = vst [vmem:[%s2323_s10 + $0xa0] sm:$0xff] %v1259_v47  ;;  %v1263_v57 = vpop.f32.mrb[23].mxu0  ;;  %1492 = vst [vmem:[%s2323_s10 + $0xb0] sm:$0xff] %v1300_v50  ;;  %v1304_v58 = vpop.f32.mrb[23].mxu1 }
 0x15c   : > { %1491 = vst [vmem:[%s2323_s10 + $0xa8] sm:$0xff] %v1261_v51  ;;  %1493 = vst [vmem:[%s2323_s10 + $0xb8] sm:$0xff] %v1302_v55 }
 0x160   : > { %v1340_v63 = vpop.f32.mrb[24].mxu0  ;;  %v1381_v2 = vpop.f32.mrb[24].mxu1 }
 0x161   : > { %v1341_v1 = vadd.f32 %v1340_v63, %v429_v59  ;;  %v1342_v3 = vpop.f32.mrb[25].mxu0  ;;  %v1382_v4 = vadd.f32 %v1381_v2, %v437_v60  ;;  %v1383_v6 = vpop.f32.mrb[25].mxu1 }
 0x162   : > { %v1343_v5 = vadd.f32 %v1342_v3, %v433_v61  ;;  %v1344_v7 = vpop.f32.mrb[26].mxu0  ;;  %v1384_v9 = vadd.f32 %v1383_v6, %v441_v62  ;;  %v1385_v8 = vpop.f32.mrb[26].mxu1 }
 0x163   : > { %1494 = vst [vmem:[%s2323_s10 + $0xc0] sm:$0xff] %v1341_v1  ;;  %v1345_v12 = vpop.f32.mrb[27].mxu0  ;;  %1496 = vst [vmem:[%s2323_s10 + $0xd0] sm:$0xff] %v1382_v4  ;;  %v1386_v10 = vpop.f32.mrb[27].mxu1 }
 0x164   : > { %1495 = vst [vmem:[%s2323_s10 + $0xc8] sm:$0xff] %v1343_v5  ;;  %1497 = vst [vmem:[%s2323_s10 + $0xd8] sm:$0xff] %v1384_v9 }
 0x168   : > { %v1422_v14 = vpop.f32.mrb[28].mxu0  ;;  %v1463_v16 = vpop.f32.mrb[28].mxu1 }
 0x169   : > { %v1423_v15 = vadd.f32 %v1422_v14, %v445_v11  ;;  %v1424_v17 = vpop.f32.mrb[29].mxu0  ;;  %v1464_v18 = vadd.f32 %v1463_v16, %v453_v0  ;;  %v1465_v21 = vpop.f32.mrb[29].mxu1 }
 0x16a   : > { %v1425_v20 = vadd.f32 %v1424_v17, %v449_v13  ;;  %v1426_v22 = vpop.f32.mrb[30].mxu0  ;;  %v1466_v23 = vadd.f32 %v1465_v21, %v457_v26  ;;  %v1467_v19 = vpop.f32.mrb[30].mxu1 }
 0x16b   : > { %1498 = vst [vmem:[%s2323_s10 + $0xe0] sm:$0xff] %v1423_v15  ;;  %v1427_v27 = vpop.f32.mrb[31].mxu0  ;;  %1500 = vst [vmem:[%s2323_s10 + $0xf0] sm:$0xff] %v1464_v18  ;;  %v1468_v24 = vpop.f32.mrb[31].mxu1 }
 0x16c   : > { %1499 = vst [vmem:[%s2323_s10 + $0xe8] sm:$0xff] %v1425_v20  ;;  %1501 = vst [vmem:[%s2323_s10 + $0xf8] sm:$0xff] %v1466_v23 }
 0x16d PF: > { %s17_s17 = sadd.s32 1, %s1896_s17   ;;  %s2429_s12 = smov %s1880_s13 }
 0x16e   : > { %p14_p9 = scmp.ge.s32.totalorder %s17_s17, 4   ;;  %s2430_s13 = smov %s1884_s14 }
 0x16f   : > { %s2431_s14 = smov %s2012_s22  ;;  %s2432_s15 = smov %s1892_s16 }
 0x170   : > { %s2433_s16 = smov %s2435_s25  ;;  %16 = sbr.rel (!%p14_p9) target bundleno = 5 (0x5), region = 80 }
 0x177   :  { %1532 = vsyncpa [#allocation3], 1 }
 0x178   :  { %1534 = vsyncpa [#allocation3 + $0x1], 1 }
 0x179   :  { %1535 = vsyncpa [#allocation5], 1 }

</bundles_post_ra>
